<compile_context>
chip_gen: v7x
topology: tpu7x:2x2x1
jax: 0.10.0
libtpu: 0.0.40
codegen_flags: <defaults>
</compile_context>

<pallas_src>
import functools

import jax
import jax.numpy as jnp
from jax import lax
from jax.experimental import pallas as pl
from jax.experimental.pallas import tpu as pltpu


# ------------------------------- fused Pallas kernel -------------------------------

def _fused_scores_kernel(n_ref,       # SMEM (1,) int32 : number of valid instances
                         x_ref,       # (TN, F)  bf16   : streamed bag-feature tile
                         wpT_ref,     # (F, E)   bf16   : projection weight, pre-transposed
                         bp_ref,      # (1, E)   f32    : projection bias
                         wkT_ref,     # (E, E)   bf16   : k_w weight, pre-transposed
                         qs_ref,      # (C, E)   f32    : q pre-scaled by 1/(||q||_F + 1e-9)
                         w1_ref,      # (H, C)   f32    : classifier linear1 (PyTorch layout)
                         b1_ref,      # (H, 1)   f32
                         w2_ref,      # (nc, H)  f32    : classifier linear2 (PyTorch layout)
                         b2_ref,      # (nc, 1)  f32
                         sum_ref,     # out (C, 1)  f32 : running column-sum of attn (grid-resident)
                         instT_ref):  # out (nc, TN) f32: instance logits, transposed (lane axis = N)
    i = pl.program_id(0)
    tn = x_ref.shape[0]

    @pl.when(i == 0)
    def _():
        sum_ref[...] = jnp.zeros_like(sum_ref)

    # projection: x_proj = relu(x @ Wp^T + bp)                       (TN, E) f32
    x_proj = jnp.maximum(
        jnp.dot(x_ref[...], wpT_ref[...], preferred_element_type=jnp.float32)
        + bp_ref[...], 0.0)

    # k = x_proj @ Wk^T                                              (TN, E) f32 (bf16 MXU inputs)
    k = jnp.dot(x_proj.astype(wkT_ref.dtype), wkT_ref[...],
                preferred_element_type=jnp.float32)

    # attn = (q / (||q||_F + 1e-9)) @ k^T / (||k_row||_2 + 1e-9)     (C, TN)
    scores = lax.dot_general(qs_ref[...], k, (((1,), (1,)), ((), ())),
                             preferred_element_type=jnp.float32)            # (C, TN)
    ones_row = jnp.ones((1, k.shape[1]), jnp.float32)
    k_sq = lax.dot_general(ones_row, k * k, (((1,), (1,)), ((), ())),
                           preferred_element_type=jnp.float32)              # (1, TN)
    inv_knorm = pl.reciprocal(jnp.sqrt(k_sq) + 1e-9, approx=True)
    attn = scores * inv_knorm                                               # (C, TN)

    # mask padded columns and accumulate the column-sum used for the bag-level mean
    col = i * tn + lax.broadcasted_iota(jnp.int32, (1, tn), 1)
    valid = col < n_ref[0]
    sum_ref[...] += jnp.sum(jnp.where(valid, attn, 0.0), axis=1, keepdims=True)

    # instance head computed transposed so N stays on the lane axis (lane-dense stores):
    #   inst_logits^T = W2 @ relu(W1 @ attn + b1) + b2               (nc, TN)
    h = jnp.maximum(
        jnp.dot(w1_ref[...], attn, preferred_element_type=jnp.float32) + b1_ref[...],
        0.0)
    instT_ref[...] = (jnp.dot(w2_ref[...], h, preferred_element_type=jnp.float32)
                      + b2_ref[...])


# ------------------------------- wrapper around pallas_call -------------------------------

def _fused_scores(x_feats, proj_w, proj_b, k_w, q_scaled,
                  cls_w1, cls_b1, cls_w2, cls_b2, *, tile_n=128):
    """Streams the bag over N-tiles; returns (attn column-sum (C,1), inst_logits^T (nc, N_pad))."""
    N, F = x_feats.shape
    C, E = q_scaled.shape
    H = cls_w1.shape[0]
    nc = cls_w2.shape[0]

    n_pad = ((N + tile_n - 1) // tile_n) * tile_n
    grid = (n_pad // tile_n,)

    # streaming input + big weights in bf16 (halves HBM traffic, bf16 MXU path);
    # biases / small classifier weights / all elementwise math stay f32.
    x_p = jnp.pad(x_feats, ((0, n_pad - N), (0, 0))).astype(jnp.bfloat16)
    wpT = proj_w.T.astype(jnp.bfloat16)                      # (F, E)  pre-transposed on host
    wkT = k_w.T.astype(jnp.bfloat16)                         # (E, E)  pre-transposed on host
    bp = proj_b.reshape(1, E).astype(jnp.float32)
    w1 = cls_w1.astype(jnp.float32)                          # (H, C)  PyTorch layout fits W1 @ attn
    b1c = cls_b1.reshape(H, 1).astype(jnp.float32)
    w2 = cls_w2.astype(jnp.float32)                          # (nc, H)
    b2c = cls_b2.reshape(nc, 1).astype(jnp.float32)
    qs = q_scaled.astype(jnp.float32)
    n_valid = jnp.array([N], jnp.int32)

    flops = 2 * n_pad * (F * E + E * E + C * E + E + H * C + nc * H)
    bytes_accessed = (x_p.size * x_p.dtype.itemsize
                      + (wpT.size + wkT.size) * 2
                      + (bp.size + qs.size + w1.size + b1c.size + w2.size + b2c.size) * 4
                      + (C + nc * n_pad) * 4)

    attn_sum, inst_logits_T = pl.pallas_call(
        _fused_scores_kernel,
        out_shape=(jax.ShapeDtypeStruct((C, 1), jnp.float32),
                   jax.ShapeDtypeStruct((nc, n_pad), jnp.float32)),
        grid_spec=pltpu.PrefetchScalarGridSpec(
            num_scalar_prefetch=1,
            grid=grid,
            in_specs=[
                pl.BlockSpec((tile_n, F), lambda i, n: (i, 0)),   # streamed, double-buffered
                pl.BlockSpec((F, E), lambda i, n: (0, 0)),
                pl.BlockSpec((1, E), lambda i, n: (0, 0)),
                pl.BlockSpec((E, E), lambda i, n: (0, 0)),
                pl.BlockSpec((C, E), lambda i, n: (0, 0)),
                pl.BlockSpec((H, C), lambda i, n: (0, 0)),
                pl.BlockSpec((H, 1), lambda i, n: (0, 0)),
                pl.BlockSpec((nc, H), lambda i, n: (0, 0)),
                pl.BlockSpec((nc, 1), lambda i, n: (0, 0)),
            ],
            out_specs=(
                pl.BlockSpec((C, 1), lambda i, n: (0, 0)),        # grid-resident accumulator
                pl.BlockSpec((nc, tile_n), lambda i, n: (0, i)),  # lane-dense instance logits
            ),
        ),
        compiler_params=pltpu.CompilerParams(
            # The N axis carries the running-mean accumulator (reduction) -> "arbitrary".
            dimension_semantics=("arbitrary",),
            # Explicit cap that is safe on v5e/v6e (128 MiB) and v7x (64 MiB physical VMEM);
            # tile_n should be sized so 2*tile_n*F*2B + scratch stays well under this.
            vmem_limit_bytes=32 * 1024 * 1024,
        ),
        cost_estimate=pl.CostEstimate(flops=flops, transcendentals=n_pad,
                                      bytes_accessed=bytes_accessed),
    )(n_valid, x_p, wpT, bp, wkT, qs, w1, b1c, w2, b2c)

    return attn_sum, inst_logits_T


# ------------------------------- model -------------------------------

def init_params(key, feature_size, embed_size, num_head, num_cluster, hidden_size,
                output_class):
    dim_k = embed_size // num_head
    ks = jax.random.split(key, 8)
    s = 0.05

    def w(k, out_f, in_f):
        return jax.random.normal(k, (out_f, in_f), jnp.float32) * s

    return {
        # projection: Linear(feature_size, embed_size, bias=True) + ReLU
        'proj_w': w(ks[0], embed_size, feature_size),
        'proj_b': jax.random.normal(ks[1], (1, embed_size), jnp.float32) * s,
        # MultiHeadCrossAttention q_w / k_w: Linear(embed_size, num_head*dim_k, bias=False)
        'q_w': w(ks[2], num_head * dim_k, embed_size),
        'k_w': w(ks[3], num_head * dim_k, embed_size),
        # weightedSumClassifier(num_cluster, hidden_size, ..., mean_dim=1)
        'cls_w1': w(ks[4], hidden_size, num_cluster),
        'cls_b1': jax.random.normal(ks[5], (1, hidden_size), jnp.float32) * s,
        'cls_w2': w(ks[6], output_class, hidden_size),
        'cls_b2': jax.random.normal(ks[7], (1, output_class), jnp.float32) * s,
    }


def phiher2_forward(params, x_feats, prototype, tile_n=128):
    N = x_feats.shape[0]

    # 1) prototype-side math (C ~ 8 rows): plain JAX — these matmuls cannot fill the MXU,
    #    a dedicated pallas_call is pure launch overhead.
    p_proj = jax.nn.relu(prototype @ params['proj_w'].T + params['proj_b'])     # (C, E)
    q = p_proj @ params['q_w'].T                                                # (C, E)
    q_scaled = q / (jnp.linalg.norm(q) + 1e-9)     # fold the global ||q||_F divide into q, once

    # 2) fused, tiled scan over the bag: projection -> k -> attn -> running mean sum
    #    -> transposed instance head, all in one pallas_call (nothing big hits HBM twice).
    attn_sum, inst_logits_T = _fused_scores(
        x_feats, params['proj_w'], params['proj_b'], params['k_w'], q_scaled,
        params['cls_w1'], params['cls_b1'], params['cls_w2'], params['cls_b2'],
        tile_n=tile_n)

    # 3) weightedSumClassifier (mean_dim=1) bag-level head on a (1, C) vector: plain JAX.
    sim_coding = (attn_sum / N).T                                               # (1, C)
    h = jax.nn.relu(sim_coding @ params['cls_w1'].T + params['cls_b1'])
    logits = h @ params['cls_w2'].T + params['cls_b2']                          # (1, nc)
    Y_prob = jax.nn.softmax(logits, axis=1)
    Y_hat = jnp.argmax(Y_prob, axis=1)                                          # (1,)

    # 4) label-is-None branch: per-instance probabilities through the same head
    #    (the (nc, N) logits were produced lane-dense by the fused kernel).
    inst_prob = jax.nn.softmax(inst_logits_T[:, :N], axis=0)                    # (nc, N)
    # TODO(synk): torch code `inst_prob[:, [Y_hat]].t()` yields a 3-D tensor on which .t()
    # errors; we implement the clearly intended (1, N) selection of class Y_hat.
    A = jnp.take(inst_prob, Y_hat[0], axis=0)[None, :]                          # (1, N)

    results_dict = {'embedding': sim_coding}
    return logits, Y_prob, Y_hat, A, results_dict


# ------------------------------- pure-JAX reference -------------------------------

def phiher2_reference(params, x_feats, prototype):
    x_proj = jax.nn.relu(x_feats @ params['proj_w'].T + params['proj_b'])
    p_proj = jax.nn.relu(prototype @ params['proj_w'].T + params['proj_b'])
    q = p_proj @ params['q_w'].T
    k = x_proj @ params['k_w'].T
    scores = q @ k.T
    k_norm = jnp.linalg.norm(k, axis=1)[None, :]
    attn = scores / (k_norm + 1e-9) / (jnp.linalg.norm(q) + 1e-9)
    sim_coding = jnp.mean(attn, axis=1)[None, :]
    h = jax.nn.relu(sim_coding @ params['cls_w1'].T + params['cls_b1'])
    logits = h @ params['cls_w2'].T + params['cls_b2']
    return logits, sim_coding


# ------------------------------- demo -------------------------------

if __name__ == "__main__":
    key = jax.random.PRNGKey(0)
    N = 300           # number of instance features in the bag (not a tile multiple: exercises masking)
    num_cluster = 8   # number of prototypes
    feature_size = 64
    embed_size = 32
    hidden_size = 16
    num_head = 1
    output_class = 2

    k_x, k_p, k_w = jax.random.split(key, 3)
    x_feats = jax.random.normal(k_x, (N, feature_size), jnp.float32)
    prototype = jax.random.normal(k_p, (num_cluster, feature_size), jnp.float32)
    params = init_params(k_w, feature_size, embed_size, num_head, num_cluster,
                         hidden_size, output_class)

    fwd = jax.jit(functools.partial(phiher2_forward, tile_n=128))
    logits, Y_prob, Y_hat, A, results_dict = fwd(params, x_feats, prototype)
    jax.block_until_ready((logits, Y_prob, Y_hat, A, results_dict['embedding']))

    # shape checks
    assert logits.shape == (1, output_class)
    assert Y_prob.shape == (1, output_class)
    assert Y_hat.shape == (1,)
    assert A.shape == (1, N)
    assert results_dict['embedding'].shape == (1, num_cluster)

    # numerical check vs a pure-JAX f32 reference (loose: bf16 MXU inputs + approx reciprocal)
    ref_logits, ref_sim = phiher2_reference(params, x_feats, prototype)
    sim_err = float(jnp.max(jnp.abs(results_dict['embedding'] - ref_sim)))
    log_err = float(jnp.max(jnp.abs(logits - ref_logits)))
    assert sim_err < 5e-2, sim_err
    assert log_err < 5e-2, log_err

    print("KERNEL_OK")
</pallas_src>

<mosaic_0001>
module attributes {stable_mosaic.version = 11 : i64} {
  func.func @_fused_scores_kernel(%arg0: i32, %arg1: memref<1xi32, #tpu.memory_space<smem>>, %arg2: memref<128x64xbf16, #tpu.memory_space<vmem>>, %arg3: memref<64x32xbf16, #tpu.memory_space<vmem>>, %arg4: memref<1x32xf32, #tpu.memory_space<vmem>>, %arg5: memref<32x32xbf16, #tpu.memory_space<vmem>>, %arg6: memref<8x32xf32, #tpu.memory_space<vmem>>, %arg7: memref<16x8xf32, #tpu.memory_space<vmem>>, %arg8: memref<16x1xf32, #tpu.memory_space<vmem>>, %arg9: memref<2x16xf32, #tpu.memory_space<vmem>>, %arg10: memref<2x1xf32, #tpu.memory_space<vmem>>, %arg11: memref<8x1xf32, #tpu.memory_space<vmem>>, %arg12: memref<2x128xf32, #tpu.memory_space<vmem>>) attributes {dimension_semantics = [#tpu.dimension_semantics<arbitrary>], iteration_bounds = array<i64: 3>, scalar_prefetch = 1 : i64, scratch_operands = 0 : i64, tpu.core_type = #tpu.core_type<tc>, window_params = [{transform_indices = @transform_0, window_bounds = array<i64: 128, 64>}, {pipeline_mode = #tpu.pipeline_mode<synchronous>, transform_indices = @transform_1, window_bounds = array<i64: 64, 32>}, {pipeline_mode = #tpu.pipeline_mode<synchronous>, transform_indices = @transform_2, window_bounds = array<i64: 1, 32>}, {pipeline_mode = #tpu.pipeline_mode<synchronous>, transform_indices = @transform_3, window_bounds = array<i64: 32, 32>}, {pipeline_mode = #tpu.pipeline_mode<synchronous>, transform_indices = @transform_4, window_bounds = array<i64: 8, 32>}, {pipeline_mode = #tpu.pipeline_mode<synchronous>, transform_indices = @transform_5, window_bounds = array<i64: 16, 8>}, {pipeline_mode = #tpu.pipeline_mode<synchronous>, transform_indices = @transform_6, window_bounds = array<i64: 16, 1>}, {pipeline_mode = #tpu.pipeline_mode<synchronous>, transform_indices = @transform_7, window_bounds = array<i64: 2, 16>}, {pipeline_mode = #tpu.pipeline_mode<synchronous>, transform_indices = @transform_8, window_bounds = array<i64: 2, 1>}, {pipeline_mode = #tpu.pipeline_mode<synchronous>, transform_indices = @transform_9, window_bounds = array<i64: 8, 1>}, {transform_indices = @transform_10, window_bounds = array<i64: 2, 128>}]} {
    %c0_i32 = arith.constant 0 : i32
    %0 = arith.cmpi eq, %arg0, %c0_i32 : i32
    %1 = arith.extui %0 : i1 to i32
    %c0_i32_0 = arith.constant 0 : i32
    %2 = arith.cmpi ne, %1, %c0_i32_0 : i32
    scf.if %2 {
      %cst_36 = arith.constant 0.000000e+00 : f32
      %54 = vector.broadcast %cst_36 : f32 to vector<8x1xf32>
      %c0_37 = arith.constant 0 : index
      %c0_38 = arith.constant 0 : index
      %55 = vector.load %arg11[%c0_37, %c0_38] : memref<8x1xf32, #tpu.memory_space<vmem>>, vector<8x1xf32>
      tpu.vector_store %arg11[%c0_37, %c0_38], %54 {strides = array<i32>} : memref<8x1xf32, #tpu.memory_space<vmem>>, vector<8x1xf32>,
    } else {
    }
    %c0 = arith.constant 0 : index
    %c0_1 = arith.constant 0 : index
    %3 = vector.load %arg2[%c0, %c0_1] : memref<128x64xbf16, #tpu.memory_space<vmem>>, vector<128x64xbf16>
    %c0_2 = arith.constant 0 : index
    %c0_3 = arith.constant 0 : index
    %4 = vector.load %arg3[%c0_2, %c0_3] : memref<64x32xbf16, #tpu.memory_space<vmem>>, vector<64x32xbf16>
    %cst = arith.constant dense<0.000000e+00> : vector<128x32xf32>
    %5 = tpu.matmul %3, %4, %cst {dimension_numbers = #tpu.dot_dimension_numbers<[1], [0], [0], [1], [0, 0, 1, 1], [], []>} : vector<128x64xbf16>, vector<64x32xbf16>, vector<128x32xf32> -> vector<128x32xf32>
    %c0_4 = arith.constant 0 : index
    %c0_5 = arith.constant 0 : index
    %6 = vector.load %arg4[%c0_4, %c0_5] : memref<1x32xf32, #tpu.memory_space<vmem>>, vector<1x32xf32>
    %7 = vector.broadcast %6 : vector<1x32xf32> to vector<128x32xf32>
    %8 = arith.addf %5, %7 : vector<128x32xf32>
    %cst_6 = arith.constant 0.000000e+00 : f32
    %9 = vector.broadcast %cst_6 : f32 to vector<128x32xf32>
    %10 = arith.maximumf %8, %9 : vector<128x32xf32>
    %11 = arith.truncf %10 : vector<128x32xf32> to vector<128x32xbf16>
    %c0_7 = arith.constant 0 : index
    %c0_8 = arith.constant 0 : index
    %12 = vector.load %arg5[%c0_7, %c0_8] : memref<32x32xbf16, #tpu.memory_space<vmem>>, vector<32x32xbf16>
    %cst_9 = arith.constant dense<0.000000e+00> : vector<128x32xf32>
    %13 = tpu.matmul %11, %12, %cst_9 {dimension_numbers = #tpu.dot_dimension_numbers<[1], [0], [0], [1], [0, 0, 1, 1], [], []>} : vector<128x32xbf16>, vector<32x32xbf16>, vector<128x32xf32> -> vector<128x32xf32>
    %c0_10 = arith.constant 0 : index
    %c0_11 = arith.constant 0 : index
    %14 = vector.load %arg6[%c0_10, %c0_11] : memref<8x32xf32, #tpu.memory_space<vmem>>, vector<8x32xf32>
    %cst_12 = arith.constant dense<0.000000e+00> : vector<8x128xf32>
    %15 = tpu.matmul %14, %13, %cst_12 {dimension_numbers = #tpu.dot_dimension_numbers<[1], [1], [0], [0], [0, 0, 1, 0], [], []>} : vector<8x32xf32>, vector<128x32xf32>, vector<8x128xf32> -> vector<8x128xf32>
    %cst_13 = arith.constant 1.000000e+00 : f32
    %16 = vector.broadcast %cst_13 : f32 to vector<1x32xf32>
    %17 = arith.mulf %13, %13 : vector<128x32xf32>
    %cst_14 = arith.constant dense<0.000000e+00> : vector<1x128xf32>
    %18 = tpu.matmul %16, %17, %cst_14 {dimension_numbers = #tpu.dot_dimension_numbers<[1], [1], [0], [0], [0, 0, 1, 0], [], []>} : vector<1x32xf32>, vector<128x32xf32>, vector<1x128xf32> -> vector<1x128xf32>
    %19 = math.sqrt %18 : vector<1x128xf32>
    %cst_15 = arith.constant 9.99999971E-10 : f32
    %20 = vector.broadcast %cst_15 : f32 to vector<1x128xf32>
    %21 = arith.addf %19, %20 : vector<1x128xf32>
    %22 = tpu.reciprocal %21 {approx = true} : vector<1x128xf32> -> vector<1x128xf32>
    %23 = vector.broadcast %22 : vector<1x128xf32> to vector<8x128xf32>
    %24 = arith.mulf %15, %23 : vector<8x128xf32>
    %c128_i32 = arith.constant 128 : i32
    %25 = arith.muli %arg0, %c128_i32 : i32
    %26 = tpu.iota {dimensions = array<i32: 1>} : vector<1x128xi32>
    %27 = vector.broadcast %25 : i32 to vector<1x128xi32>
    %28 = arith.addi %27, %26 : vector<1x128xi32>
    %c0_16 = arith.constant 0 : index
    %29 = memref.load %arg1[%c0_16] : memref<1xi32, #tpu.memory_space<smem>>
    %30 = vector.broadcast %29 : i32 to vector<1x128xi32>
    %31 = arith.cmpi slt, %28, %30 : vector<1x128xi32>
    %c0_17 = arith.constant 0 : index
    %c0_18 = arith.constant 0 : index
    %32 = vector.load %arg11[%c0_17, %c0_18] : memref<8x1xf32, #tpu.memory_space<vmem>>, vector<8x1xf32>
    %cst_19 = arith.constant 0.000000e+00 : f32
    %33 = vector.shape_cast %31 : vector<1x128xi1> to vector<1x128xi1>
    %34 = vector.broadcast %33 : vector<1x128xi1> to vector<8x128xi1>
    %35 = vector.broadcast %cst_19 : f32 to vector<8x128xf32>
    %36 = arith.select %34, %24, %35 : vector<8x128xi1>, vector<8x128xf32>
    %cst_20 = arith.constant dense<0.000000e+00> : vector<8xf32>
    %37 = vector.multi_reduction <add>, %36, %cst_20 [1] : vector<8x128xf32> to vector<8xf32>
    %38 = vector.shape_cast %37 : vector<8xf32> to vector<8x1xf32>
    %39 = arith.addf %32, %38 : vector<8x1xf32>
    %c0_21 = arith.constant 0 : index
    %c0_22 = arith.constant 0 : index
    %40 = vector.load %arg11[%c0_21, %c0_22] : memref<8x1xf32, #tpu.memory_space<vmem>>, vector<8x1xf32>
    tpu.vector_store %arg11[%c0_21, %c0_22], %39 {strides = array<i32>} : memref<8x1xf32, #tpu.memory_space<vmem>>, vector<8x1xf32>,
    %c0_23 = arith.constant 0 : index
    %c0_24 = arith.constant 0 : index
    %41 = vector.load %arg7[%c0_23, %c0_24] : memref<16x8xf32, #tpu.memory_space<vmem>>, vector<16x8xf32>
    %cst_25 = arith.constant dense<0.000000e+00> : vector<16x128xf32>
    %42 = tpu.matmul %41, %24, %cst_25 {dimension_numbers = #tpu.dot_dimension_numbers<[1], [0], [0], [1], [0, 0, 1, 1], [], []>} : vector<16x8xf32>, vector<8x128xf32>, vector<16x128xf32> -> vector<16x128xf32>
    %c0_26 = arith.constant 0 : index
    %c0_27 = arith.constant 0 : index
    %43 = vector.load %arg8[%c0_26, %c0_27] : memref<16x1xf32, #tpu.memory_space<vmem>>, vector<16x1xf32>
    %44 = vector.broadcast %43 : vector<16x1xf32> to vector<16x128xf32>
    %45 = arith.addf %42, %44 : vector<16x128xf32>
    %cst_28 = arith.constant 0.000000e+00 : f32
    %46 = vector.broadcast %cst_28 : f32 to vector<16x128xf32>
    %47 = arith.maximumf %45, %46 : vector<16x128xf32>
    %c0_29 = arith.constant 0 : index
    %c0_30 = arith.constant 0 : index
    %48 = vector.load %arg9[%c0_29, %c0_30] : memref<2x16xf32, #tpu.memory_space<vmem>>, vector<2x16xf32>
    %cst_31 = arith.constant dense<0.000000e+00> : vector<2x128xf32>
    %49 = tpu.matmul %48, %47, %cst_31 {dimension_numbers = #tpu.dot_dimension_numbers<[1], [0], [0], [1], [0, 0, 1, 1], [], []>} : vector<2x16xf32>, vector<16x128xf32>, vector<2x128xf32> -> vector<2x128xf32>
    %c0_32 = arith.constant 0 : index
    %c0_33 = arith.constant 0 : index
    %50 = vector.load %arg10[%c0_32, %c0_33] : memref<2x1xf32, #tpu.memory_space<vmem>>, vector<2x1xf32>
    %51 = vector.broadcast %50 : vector<2x1xf32> to vector<2x128xf32>
    %52 = arith.addf %49, %51 : vector<2x128xf32>
    %c0_34 = arith.constant 0 : index
    %c0_35 = arith.constant 0 : index
    %53 = vector.load %arg12[%c0_34, %c0_35] : memref<2x128xf32, #tpu.memory_space<vmem>>, vector<2x128xf32>
    tpu.vector_store %arg12[%c0_34, %c0_35], %52 {strides = array<i32>} : memref<2x128xf32, #tpu.memory_space<vmem>>, vector<2x128xf32>,
    return
  }
  func.func @transform_0(%arg0: i32, %arg1: memref<1xi32, #tpu.memory_space<smem>>) -> (i32, i32) {
    %c0_i32 = arith.constant 0 : i32
    %c0_i32_0 = arith.constant 0 : i32
    return %arg0, %c0_i32 : i32, i32
  }
  func.func @transform_1(%arg0: i32, %arg1: memref<1xi32, #tpu.memory_space<smem>>) -> (i32, i32) {
    %c0_i32 = arith.constant 0 : i32
    %c0_i32_0 = arith.constant 0 : i32
    %c0_i32_1 = arith.constant 0 : i32
    return %c0_i32, %c0_i32_0 : i32, i32
  }
  func.func @transform_2(%arg0: i32, %arg1: memref<1xi32, #tpu.memory_space<smem>>) -> (i32, i32) {
    %c0_i32 = arith.constant 0 : i32
    %c0_i32_0 = arith.constant 0 : i32
    %c0_i32_1 = arith.constant 0 : i32
    return %c0_i32, %c0_i32_0 : i32, i32
  }
  func.func @transform_3(%arg0: i32, %arg1: memref<1xi32, #tpu.memory_space<smem>>) -> (i32, i32) {
    %c0_i32 = arith.constant 0 : i32
    %c0_i32_0 = arith.constant 0 : i32
    %c0_i32_1 = arith.constant 0 : i32
    return %c0_i32, %c0_i32_0 : i32, i32
  }
  func.func @transform_4(%arg0: i32, %arg1: memref<1xi32, #tpu.memory_space<smem>>) -> (i32, i32) {
    %c0_i32 = arith.constant 0 : i32
    %c0_i32_0 = arith.constant 0 : i32
    %c0_i32_1 = arith.constant 0 : i32
    return %c0_i32, %c0_i32_0 : i32, i32
  }
  func.func @transform_5(%arg0: i32, %arg1: memref<1xi32, #tpu.memory_space<smem>>) -> (i32, i32) {
    %c0_i32 = arith.constant 0 : i32
    %c0_i32_0 = arith.constant 0 : i32
    %c0_i32_1 = arith.constant 0 : i32
    return %c0_i32, %c0_i32_0 : i32, i32
  }
  func.func @transform_6(%arg0: i32, %arg1: memref<1xi32, #tpu.memory_space<smem>>) -> (i32, i32) {
    %c0_i32 = arith.constant 0 : i32
    %c0_i32_0 = arith.constant 0 : i32
    %c0_i32_1 = arith.constant 0 : i32
    return %c0_i32, %c0_i32_0 : i32, i32
  }
  func.func @transform_7(%arg0: i32, %arg1: memref<1xi32, #tpu.memory_space<smem>>) -> (i32, i32) {
    %c0_i32 = arith.constant 0 : i32
    %c0_i32_0 = arith.constant 0 : i32
    %c0_i32_1 = arith.constant 0 : i32
    return %c0_i32, %c0_i32_0 : i32, i32
  }
  func.func @transform_8(%arg0: i32, %arg1: memref<1xi32, #tpu.memory_space<smem>>) -> (i32, i32) {
    %c0_i32 = arith.constant 0 : i32
    %c0_i32_0 = arith.constant 0 : i32
    %c0_i32_1 = arith.constant 0 : i32
    return %c0_i32, %c0_i32_0 : i32, i32
  }
  func.func @transform_9(%arg0: i32, %arg1: memref<1xi32, #tpu.memory_space<smem>>) -> (i32, i32) {
    %c0_i32 = arith.constant 0 : i32
    %c0_i32_0 = arith.constant 0 : i32
    %c0_i32_1 = arith.constant 0 : i32
    return %c0_i32, %c0_i32_0 : i32, i32
  }
  func.func @transform_10(%arg0: i32, %arg1: memref<1xi32, #tpu.memory_space<smem>>) -> (i32, i32) {
    %c0_i32 = arith.constant 0 : i32
    %c0_i32_0 = arith.constant 0 : i32
    return %c0_i32, %arg0 : i32, i32
  }
}

</mosaic_0001>

<bundles_post_ra>
// kernel: phiher2_forward.1
= control target key start
LH: loop header
LB: loop body
LE: loop exit
PB: predicated region body
PF: predicated region fallthrough
CT: control target
= control target key end

     0   :  { %s1721_s19 = smov 0   ;;  %s1890_s0 = inlined_call_operand.<no memory space> [shape: s32[1], index: 0, kind: input, shape index: {}]   ;;  %s1891_s1 = inlined_call_operand.vmem [shape: bf16[384,64], index: 1, kind: input, shape index: {}]   ;;  %s1892_s2 = inlined_call_operand.vmem [shape: bf16[64,32], index: 2, kind: input, shape index: {}]   ;;  %s1893_s3 = inlined_call_operand.vmem [shape: f32[1,32], index: 3, kind: input, shape index: {}]   ;;  %s1894_s4 = inlined_call_operand.vmem [shape: bf16[32,32], index: 4, kind: input, shape index: {}]   ;;  %s1895_s5 = inlined_call_operand.vmem [shape: f32[8,32], index: 5, kind: input, shape index: {}]   ;;  %s1896_s6 = inlined_call_operand.vmem [shape: f32[16,8], index: 6, kind: input, shape index: {}]   ;;  %s1897_s7 = inlined_call_operand.vmem [shape: f32[16,1], index: 7, kind: input, shape index: {}]   ;;  %s1898_s8 = inlined_call_operand.vmem [shape: f32[2,16], index: 8, kind: input, shape index: {}]   ;;  %s1899_s9 = inlined_call_operand.vmem [shape: f32[2,1], index: 9, kind: input, shape index: {}]   ;;  %s1900_s10 = inlined_call_operand.vmem [shape: f32[8,1], index: 10, kind: output, shape index: {0}]   ;;  %s1901_s11 = inlined_call_operand.vmem [shape: f32[2,384], index: 11, kind: output, shape index: {1}]  }
   0x1   :  { %17 = sst [smem:[#allocation3]] %s1890_s0 }
   0x2 LB: > { %s1727_s20 = sadd.s32 4294967295, %s1650_s19   ;;  %p1279_p0 = scmp.ge.s32.totalorder %s1650_s19, 1  ;;  %s1650_s19 = sphi %s1721_s19, %s23_s19  }
   0x3   : > { %p313_p1 = scmp.lt.s32.totalorder %s1650_s19, 4 }
   0x5   : > { %p314_p2 = pnand %p1279_p0, %p313_p1 }
   0x6   : > { %s1280_s0 = sshll.u32 (!%p314_p2), %s1727_s20, 4  ;;  %p356_p3 = scmp.lt.s32.totalorder (!%p314_p2), %s1727_s20, 2 }
   0x7   : > { %317 = sbr.rel (%p314_p2) target bundleno = 1226 (0x4ca), region = 56  ;;  %p351_p4 = scmp.lt.s32.totalorder (!%p314_p2), %s1280_s0, 47 }
   0x8   : > { %p1283_p5 = scmp.ne.s32.totalorder (!%p314_p2), %s1727_s20, 0 }
   0xe   : > { %s357_s21 = scalar_select %p356_p3, %s1727_s20, 2 }
   0xf   : > { %s1905_s0 = smov (!%p351_p4, %s1280_s0), 47  ;;  %364 = sbr.rel (%p1283_p5) target bundleno = 22 (0x16), region = 60 }
  0x10   : > { %s1282_s22 = sshll.u32 %s357_s21, 1  ;;  %s1281_s23 = sshll.u32 %s1905_s0, 2  ;;  %vm365_vm0 = vcmask (!%p1283_p5), 7168   ;;  %v1652_v0 = vmov (!%p1283_p5), 0.0  }
  0x11   : > { %s1737_s26 = scalar_lea.vmem %s1901_s11, %s1282_s22  ;;  %s1742_s29 = scalar_lea.vmem %s1891_s1, %s1281_s23  ;;  %366 = vst.msk [vmem:[%s1900_s10] sm:$0xff] (!%p1283_p5), %vm365_vm0, %v1652_v0 }
  0x16 PF: > { %v1626_v1 = vld [vmem:[%s1892_s2] sm:$0xff]   ;;  %v1627_v2 = vld [vmem:[%s1892_s2 + $0x8] sm:$0xff]   ;;  %v1628_v3 = vld [vmem:[%s1892_s2 + $0x10] sm:$0xff]   ;;  %vm462_vm1 = vcmask 523264   ;;  %vm624_vm2 = vcmask 261120   ;;  %vm1654_vm3 = vmmov 0  }
  0x17   : > { %1417 = vmatprep.subr.bf16.mxu0 %v1626_v1  ;;  %v1630_v4 = vld [vmem:[%s1742_s29] sm:$0xff]   ;;  %v1629_v5 = vld [vmem:[%s1892_s2 + $0x18] sm:$0xff]   ;;  %v1631_v6 = vld [vmem:[%s1742_s29 + $0x8] sm:$0xff]   ;;  %vm1050_vm5 = vcmask 64512   ;;  %s1024_s18 = sld [smem:[#allocation3]]  ;;  %s1349_s0 = sshll.u32 %s1727_s20, 7 }
  0x18   : > { %1418 = vmatpush3.bf16.msra.mxu0 %v1626_v1  ;;  %1425 = vmatprep.mubr.msk.bf16.mxu0 %vm462_vm1, %v1630_v4  ;;  %v1632_v7 = vld [vmem:[%s1742_s29 + $0x10] sm:$0xff]   ;;  %v1633_v8 = vld [vmem:[%s1742_s29 + $0x18] sm:$0xff]   ;;  %v1634_v9 = vld [vmem:[%s1742_s29 + $0x20] sm:$0xff]   ;;  %vm1034_vm9 = vcmask 7168   ;;  %vm1141_vm10 = vcmask 130048  }
  0x19   : > { %1419 = vmatprep.subr.bf16.mxu0 %v1627_v2  ;;  %v1635_v10 = vld [vmem:[%s1742_s29 + $0x28] sm:$0xff]   ;;  %v1636_v11 = vld [vmem:[%s1742_s29 + $0x30] sm:$0xff]   ;;  %v1637_v12 = vld [vmem:[%s1742_s29 + $0x38] sm:$0xff]  }
  0x1a   : > { %v1638_v13 = vld [vmem:[%s1894_s4] sm:$0xff]   ;;  %v1639_v14 = vld [vmem:[%s1894_s4 + $0x8] sm:$0xff]   ;;  %vm1801_vm4 = vmpackc.low %vm624_vm2, %vm624_vm2 }
  0x1b   : > { %1441 = vmatprep.subr.bf16.mxu1 %v1638_v13  ;;  %v1284_v15 = vld [vmem:[%s1893_s3] ss:$0 sm:$0xff] }
  0x1c   : > { %1420 = vmatpush3.bf16.msra.mxu0 %v1627_v2  ;;  %1442 = vmatpush3.bf16.msra.mxu1 %v1638_v13  ;;  %v1014_v13 = vlaneseq }
  0x1d   : > { %1421 = vmatprep.subr.bf16.mxu0 %v1628_v3  ;;  %1443 = vmatprep.subr.bf16.mxu1 %v1639_v14 }
  0x20   : > { %1422 = vmatpush3.bf16.msra.mxu0 %v1628_v3  ;;  %1444 = vmatpush3.bf16.msra.mxu1 %v1639_v14 }
  0x21   : > { %1423 = vmatprep.subr.bf16.mxu0 %v1629_v5 }
  0x24   : > { %1424 = vmatpush3.bf16.msra.mxu0 %v1629_v5 }
  0x27   : > { %1426 = vmatmul.mubr.msk.bf16.vlgmr.msra.gmra.mrb[0].mxu0 %vm462_vm1, %v1631_v6 }
  0x28   : > { %1429 = vmatprep.mubr.msk.bf16.mxu0 %vm462_vm1, %v1632_v7 }
  0x2f   : > { %1430 = vmatmul.mubr.msk.bf16.gmra.mrb[4].mxu0 %vm462_vm1, %v1633_v8  ;;  %v1653_v8 = vmov 0.0|0.0  }
  0x30   : > { %1433 = vmatprep.mubr.msk.bf16.mxu0 %vm462_vm1, %v1634_v9  ;;  %1543 = vmatprep.subr.bf16.mxu1 %v1653_v8  ;;  %v1655_v9 = vmov 0.0  }
  0x31   : > { %1575 = vmatprep.subr.bf16.mxu0 %v1653_v8 }
  0x37   : > { %1434 = vmatmul.mubr.msk.bf16.gmra.mrb[8].mxu0 %vm462_vm1, %v1635_v10 }
  0x38   : > { %1437 = vmatprep.mubr.msk.bf16.mxu0 %vm462_vm1, %v1636_v11 }
  0x3f   : > { %1438 = vmatmul.mubr.msk.bf16.gmra.mrb[12].mxu0 %vm462_vm1, %v1637_v12 }
  0x40   : > { %1528 = vmatprep.mubr.msk.f32.mxu0 %vm1654_vm3, %v1655_v9 }
  0xfa   : > { %v1427_v16 = vpop.f32.mrb[0].mxu0 }
  0xfb   : > { %v530_v17 = vadd.f32 %v1427_v16, %v1284_v15  ;;  %v521_v18 = vpop.f32.mrb[1].mxu0 }
  0xfc   : > { %v522_v19 = vadd.f32 %v1284_v15, %v521_v18  ;;  %v1428_v20 = vpop.f32.mrb[2].mxu0 }
  0xfd   : > { %v533_v21 = vadd.f32 %v1428_v20, %v1284_v15  ;;  %v524_v22 = vpop.f32.mrb[3].mxu0  ;;  %v586_v24 = vmax.f32 %v530_v17, 0.0 }
  0xfe   : > { %v525_v23 = vadd.f32 %v1284_v15, %v524_v22  ;;  %v584_v26 = vmax.f32 %v522_v19, 0.0 }
  0xff   : > { %v587_v25 = vmax.f32 %v533_v21, 0.0 }
 0x100   : > { %v585_v27 = vmax.f32 %v525_v23, 0.0 }
 0x101   : > { %v601_v28 = vpack.c.bf16 %v587_v25, %v586_v24 }
 0x102   : > { %v1431_v29 = vpop.f32.mrb[4].mxu0  ;;  %v600_v30 = vpack.c.bf16 %v585_v27, %v584_v26 }
 0x103   : > { %v546_v31 = vadd.f32 %v1431_v29, %v1284_v15  ;;  %v537_v32 = vpop.f32.mrb[5].mxu0 }
 0x104   : > { %v538_v33 = vadd.f32 %v1284_v15, %v537_v32  ;;  %1445 = vmatprep.mubr.msk.bf16.mxu1 %vm624_vm2, %v600_v30  ;;  %v1432_v34 = vpop.f32.mrb[6].mxu0 }
 0x105   : > { %v590_v35 = vmax.f32 %v546_v31, 0.0  ;;  %v549_v36 = vadd.f32 %v1432_v34, %v1284_v15  ;;  %1446 = vmatmul.mubr.msk.bf16.vlgmr.msra.gmra.mrb[0].mxu1 %vm624_vm2, %v601_v28  ;;  %v540_v37 = vpop.f32.mrb[7].mxu0 }
 0x106   : > { %v588_v38 = vmax.f32 %v538_v33, 0.0  ;;  %v541_v39 = vadd.f32 %v1284_v15, %v540_v37 }
 0x107   : > { %v591_v40 = vmax.f32 %v549_v36, 0.0 }
 0x108   : > { %v589_v41 = vmax.f32 %v541_v39, 0.0 }
 0x109   : > { %v603_v42 = vpack.c.bf16 %v591_v40, %v590_v35 }
 0x10a   : > { %v602_v43 = vpack.c.bf16 %v589_v41, %v588_v38  ;;  %v1435_v44 = vpop.f32.mrb[8].mxu0 }
 0x10b   : > { %v562_v45 = vadd.f32 %v1435_v44, %v1284_v15  ;;  %v553_v46 = vpop.f32.mrb[9].mxu0 }
 0x10c   : > { %1449 = vmatprep.mubr.msk.bf16.mxu1 %vm624_vm2, %v602_v43  ;;  %v554_v47 = vadd.f32 %v1284_v15, %v553_v46  ;;  %v1436_v48 = vpop.f32.mrb[10].mxu0 }
 0x10d   : > { %1450 = vmatmul.mubr.msk.bf16.gmra.mrb[4].mxu1 %vm624_vm2, %v603_v42  ;;  %v594_v49 = vmax.f32 %v562_v45, 0.0  ;;  %v565_v50 = vadd.f32 %v1436_v48, %v1284_v15  ;;  %v556_v51 = vpop.f32.mrb[11].mxu0 }
 0x10e   : > { %v592_v52 = vmax.f32 %v554_v47, 0.0  ;;  %v557_v53 = vadd.f32 %v1284_v15, %v556_v51 }
 0x10f   : > { %v595_v54 = vmax.f32 %v565_v50, 0.0 }
 0x110   : > { %v593_v55 = vmax.f32 %v557_v53, 0.0 }
 0x111   : > { %v605_v56 = vpack.c.bf16 %v595_v54, %v594_v49 }
 0x112   : > { %v604_v57 = vpack.c.bf16 %v593_v55, %v592_v52  ;;  %v1439_v58 = vpop.f32.mrb[12].mxu0 }
 0x113   : > { %v578_v59 = vadd.f32 %v1439_v58, %v1284_v15  ;;  %v569_v60 = vpop.f32.mrb[13].mxu0 }
 0x114   : > { %1453 = vmatprep.mubr.msk.bf16.mxu1 %vm624_vm2, %v604_v57  ;;  %v570_v61 = vadd.f32 %v1284_v15, %v569_v60  ;;  %v1440_v62 = vpop.f32.mrb[14].mxu0  ;;  %v1656_v60 = vmov 1.0  }
 0x115   : > { %1454 = vmatmul.mubr.msk.bf16.gmra.mrb[8].mxu1 %vm624_vm2, %v605_v56  ;;  %v598_v63 = vmax.f32 %v578_v59, 0.0  ;;  %v581_v0 = vadd.f32 %v1440_v62, %v1284_v15  ;;  %v572_v1 = vpop.f32.mrb[15].mxu0  ;;  %v746_v59 = vld [vmem:[%s1895_s5] sm:$0xff] }
 0x116   : > { %v596_v2 = vmax.f32 %v570_v61, 0.0  ;;  %v573_v3 = vadd.f32 %v1284_v15, %v572_v1  ;;  %v1036_v61 = vld [vmem:[%s1896_s6] sm:$0xff] }
 0x117   : > { %v599_v4 = vmax.f32 %v581_v0, 0.0  ;;  %v1038_v62 = vld [vmem:[%s1897_s7] sm:$0xff]  ;;  %v1039_v0 = vld [vmem:[%s1897_s7 + $0x8] sm:$0xff] }
 0x118   : > { %v597_v5 = vmax.f32 %v573_v3, 0.0 }
 0x119   : > { %v607_v6 = vpack.c.bf16 %v599_v4, %v598_v63  ;;  %v1657_v63 = vmov 0  }
 0x11a   : > { %v606_v7 = vpack.c.bf16 %v597_v5, %v596_v2  ;;  %1624 = vset.pattern.permute.xlu0 %v1657_v63  ;;  %1625 = vset.pattern.permute.xlu1 %v1657_v63 }
 0x11b   : > { %1042 = vperm.xlu0 %1624, %v1038_v62  }
 0x11c   : > { %1457 = vmatprep.mubr.msk.bf16.mxu1 %vm624_vm2, %v606_v7 }
 0x11d   : > { %1458 = vmatmul.mubr.msk.bf16.gmra.mrb[12].mxu1 %vm624_vm2, %v607_v6 }
 0x11e   : > { %1493 = vmatprep.mubr.msk.f32.mxu1 %vm1654_vm3, %v1655_v9 }
 0x11f   : > { %1047 = vperm.xlu0 %1624, %v1039_v0  }
 0x1d8   : > { %v1447_v10 = vpop.f32.mrb[0].mxu1 }
 0x1d9   : > { %v683_v11 = vpop.f32.mrb[1].mxu1  ;;  %v870_v14 = vmul.f32 %v1447_v10, %v1447_v10 }
 0x1da   : > { %v1448_v12 = vpop.f32.mrb[2].mxu1  ;;  %v868_v18 = vmul.f32 %v683_v11, %v683_v11 }
 0x1db   : > { %v1548_v15 = vpack.c.bf16 %v1448_v12, %v1447_v10  ;;  %v871_v16 = vmul.f32 %v1448_v12, %v1448_v12  ;;  %v686_v17 = vpop.f32.mrb[3].mxu1 }
 0x1dc   : > { %v1544_v19 = vpack.c.bf16 %v686_v17, %v683_v11  ;;  %v869_v20 = vmul.f32 %v686_v17, %v686_v17 }
 0x1dd   : > { %v1580_v21 = vpack.c.bf16 %v871_v16, %v870_v14  ;;  %v1015_v14 = vshrl.u32 %v1014_v13, 7  ;;  %v1022_v16 = vstv %s1349_s0 }
 0x1de   : > { %v1576_v22 = vpack.c.bf16 %v869_v20, %v868_v18  ;;  %1546 = vmatpush3.bf16.xpose.msk.msra.mxu1 %vm1801_vm4, %v1544_v19  ;;  %v1025_v19 = vstv %s1024_s18 }
 0x1df   : > { %1547 = vmatprep.subr.bf16.mxu1 %v1653_v8  ;;  %v1016_v17 = vsub.s32 0, %v1015_v14 }
 0x1e0   : > { %1578 = vmatpush3.bf16.xpose.msk.msra.mxu0 %vm1801_vm4, %v1576_v22  ;;  %v1451_v23 = vpop.f32.mrb[4].mxu1 }
 0x1e1   : > { %v874_v24 = vmul.f32 %v1451_v23, %v1451_v23  ;;  %v699_v25 = vpop.f32.mrb[5].mxu1  ;;  %1579 = vmatprep.subr.bf16.mxu0 %v1653_v8 }
 0x1e2   : > { %v872_v26 = vmul.f32 %v699_v25, %v699_v25  ;;  %v1452_v27 = vpop.f32.mrb[6].mxu1 }
 0x1e3   : > { %v1556_v28 = vpack.c.bf16 %v1452_v27, %v1451_v23  ;;  %v875_v29 = vmul.f32 %v1452_v27, %v1452_v27  ;;  %v702_v30 = vpop.f32.mrb[7].mxu1  ;;  %v1037_v23 = vld [vmem:[%s1896_s6 + $0x8] sm:$0xff] }
 0x1e4   : > { %v1552_v31 = vpack.c.bf16 %v702_v30, %v699_v25  ;;  %v873_v32 = vmul.f32 %v702_v30, %v702_v30  ;;  %v1135_v25 = vld [vmem:[%s1899_s9] sm:$0x3] }
 0x1e5   : > { %v1588_v33 = vpack.c.bf16 %v875_v29, %v874_v24 }
 0x1e6   : > { %v1584_v34 = vpack.c.bf16 %v873_v32, %v872_v26  ;;  %1550 = vmatpush3.bf16.xpose.msk.msra.mxu1 %vm1801_vm4, %v1548_v15  ;;  %v1021_v15 = vand.u32 127, %v1014_v13  ;;  %v1027_v26 = vld [vmem:[%s1900_s10] sm:$0xff] }
 0x1e7   : > { %1551 = vmatprep.subr.bf16.mxu1 %v1653_v8 }
 0x1e8   : > { %1582 = vmatpush3.bf16.xpose.msk.msra.mxu0 %vm1801_vm4, %v1580_v21  ;;  %v1455_v35 = vpop.f32.mrb[8].mxu1  ;;  %v1023_v18 = vadd.s32 %v1022_v16, %v1021_v15 }
 0x1e9   : > { %1583 = vmatprep.subr.bf16.mxu0 %v1653_v8  ;;  %v878_v36 = vmul.f32 %v1455_v35, %v1455_v35  ;;  %v715_v37 = vpop.f32.mrb[9].mxu1 }
 0x1ea   : > { %v876_v38 = vmul.f32 %v715_v37, %v715_v37  ;;  %v1456_v39 = vpop.f32.mrb[10].mxu1  ;;  %vm1026_vm8 = vcmp.lt.s32.totalorder %v1023_v18, %v1025_v19 }
 0x1eb   : > { %v1564_v40 = vpack.c.bf16 %v1456_v39, %v1455_v35  ;;  %v879_v41 = vmul.f32 %v1456_v39, %v1456_v39  ;;  %v718_v42 = vpop.f32.mrb[11].mxu1 }
 0x1ec   : > { %v1560_v43 = vpack.c.bf16 %v718_v42, %v715_v37  ;;  %v877_v44 = vmul.f32 %v718_v42, %v718_v42 }
 0x1ed   : > { %v1596_v45 = vpack.c.bf16 %v879_v41, %v878_v36  ;;  %v1134_v36 = vld [vmem:[%s1898_s8] sm:$0x3] }
 0x1ee   : > { %1554 = vmatpush3.bf16.xpose.msk.msra.mxu1 %vm1801_vm4, %v1552_v31  ;;  %v1592_v46 = vpack.c.bf16 %v877_v44, %v876_v38 }
 0x1ef   : > { %1555 = vmatprep.subr.bf16.mxu1 %v1653_v8 }
 0x1f0   : > { %1586 = vmatpush3.bf16.xpose.msk.msra.mxu0 %vm1801_vm4, %v1584_v34  ;;  %v1459_v47 = vpop.f32.mrb[12].mxu1 }
 0x1f1   : > { %1587 = vmatprep.subr.bf16.mxu0 %v1653_v8  ;;  %v882_v48 = vmul.f32 %v1459_v47, %v1459_v47  ;;  %v731_v49 = vpop.f32.mrb[13].mxu1 }
 0x1f2   : > { %v880_v50 = vmul.f32 %v731_v49, %v731_v49  ;;  %v1460_v51 = vpop.f32.mrb[14].mxu1 }
 0x1f3   : > { %v1572_v52 = vpack.c.bf16 %v1460_v51, %v1459_v47  ;;  %v883_v53 = vmul.f32 %v1460_v51, %v1460_v51  ;;  %v734_v54 = vpop.f32.mrb[15].mxu1 }
 0x1f4   : > { %v1568_v55 = vpack.c.bf16 %v734_v54, %v731_v49  ;;  %v881_v56 = vmul.f32 %v734_v54, %v734_v54 }
 0x1f5   : > { %v1604_v57 = vpack.c.bf16 %v883_v53, %v882_v48 }
 0x1f6   : > { %1558 = vmatpush3.bf16.xpose.msk.msra.mxu1 %vm1801_vm4, %v1556_v28  ;;  %v1600_v58 = vpack.c.bf16 %v881_v56, %v880_v50 }
 0x1f7   : > { %1559 = vmatprep.subr.bf16.mxu1 %v1653_v8 }
 0x1f8   : > { %1590 = vmatpush3.bf16.xpose.msk.msra.mxu0 %vm1801_vm4, %v1588_v33 }
 0x1f9   : > { %1591 = vmatprep.subr.bf16.mxu0 %v1653_v8 }
 0x1fe   : > { %1562 = vmatpush3.bf16.xpose.msk.msra.mxu1 %vm1801_vm4, %v1560_v43 }
 0x1ff   : > { %1563 = vmatprep.subr.bf16.mxu1 %v1653_v8 }
 0x200   : > { %1594 = vmatpush3.bf16.xpose.msk.msra.mxu0 %vm1801_vm4, %v1592_v46 }
 0x201   : > { %1595 = vmatprep.subr.bf16.mxu0 %v1653_v8 }
 0x206   : > { %1566 = vmatpush3.bf16.xpose.msk.msra.mxu1 %vm1801_vm4, %v1564_v40 }
 0x207   : > { %1567 = vmatprep.subr.bf16.mxu1 %v1653_v8 }
 0x208   : > { %1598 = vmatpush3.bf16.xpose.msk.msra.mxu0 %vm1801_vm4, %v1596_v45 }
 0x209   : > { %1599 = vmatprep.subr.bf16.mxu0 %v1653_v8 }
 0x20e   : > { %1570 = vmatpush3.bf16.xpose.msk.msra.mxu1 %vm1801_vm4, %v1568_v55 }
 0x20f   : > { %1571 = vmatprep.subr.bf16.mxu1 %v1653_v8 }
 0x210   : > { %1602 = vmatpush3.bf16.xpose.msk.msra.mxu0 %vm1801_vm4, %v1600_v58 }
 0x211   : > { %1603 = vmatprep.subr.bf16.mxu0 %v1653_v8 }
 0x216   : > { %1574 = vmatpush3.bf16.xpose.msk.msra.mxu1 %vm1801_vm4, %v1572_v52 }
 0x218   : > { %1606 = vmatpush3.bf16.xpose.msk.msra.mxu0 %vm1801_vm4, %v1604_v57 }
 0x21d   : > { %1494 = vmatmul.mubr.msk.f32.vlgmr.msra.gmra.mrb[16].mxu1 %vm624_vm2, %v746_v59 }
 0x21e   : > { %1533 = vmatprep.mubr.msk.f32.mxu1 %vm1050_vm5, %v1036_v61 }
 0x21f   : > { %1529 = vmatmul.mubr.msk.f32.vlgmr.msra.gmra.mrb[16].mxu0 %vm624_vm2, %v1656_v60 }
 0x2f0   : > { %v864_v1 = vpop.f32.mrb[16].mxu1 }
 0x2f1   : > { %v1495_v2 = vpop.f32.mrb[17].mxu1 }
 0x2f2   : > { %v1001_v3 = vpop.f32.mrb[16].mxu0 }
 0x2f3   : > { %1640 = vrsqrt.f32 %v1001_v3  ;;  %v1530_v4 = vpop.f32.mrb[17].mxu0  ;;  %vm1007_vm6 = vcmp.eq.f32.partialorder %v1001_v3, inf  ;;  %v1010_v7 = vand.u32 2147483648, %v1001_v3  ;;  %vm1009_vm7 = vcmp.eq.f32.partialorder %v1001_v3, 0.0 }
 0x2fd   : > { %v1641_v5 = vpop.eup %1640 }
 0x2fe   : > { %v1006_v6 = vmul.f32 %v1641_v5, %v1001_v3 }
 0x300   : > { %v1008_v10 = vsel %vm1007_vm6, %v1001_v3, %v1006_v6 }
 0x301   : > { %v1011_v11 = vsel %vm1009_vm7, %v1010_v7, %v1008_v10 }
 0x302   : > { %v1012_v12 = vadd.f32 1e-09, %v1011_v11 }
 0x304   : > { %1642 = vrcp.f32 %v1012_v12 }
 0x30e   : > { %v1643_v20 = vpop.eup %1642 }
 0x30f   : > { %v1017_v21 = vrot.slane %v1643_v20, %v1016_v17 }
 0x311   : > { %v1018_v22 = vmul.f32 %v1017_v21, %v864_v1 }
 0x313   : > { %1531 = vmatprep.subr.mxu1 %v1018_v22  ;;  %v1030_v24 = vsel %vm1026_vm8, %v1018_v22, 0.0 }
 0x314   : > { %1532 = vmatpush3.msra.mxu1 %v1018_v22  ;;  %1031 = vadd.xlane.f32.xlu1 %v1030_v24 }
 0x315   : > { %1534 = vmatmul.mubr.msk.f32.vlgmr.msra.gmra.mrb[18].mxu1 %vm1050_vm5, %v1037_v23  ;;  %1607 = vmatprep.subr.bf16.mxu1 %v1653_v8  ;;  %v1043_v8 = vpop.permute.xlu0 %1042 }
 0x316   : > { %1540 = vmatprep.mubr.msk.f32.mxu1 %vm1654_vm3, %v1655_v9 }
 0x319   : > { %v1048_v29 = vpop.permute.xlu0 %1047 }
 0x325   : > { %1138 = vperm.xlu1 %1625, %v1135_v25  }
 0x3a1   : > { %v1032_v27 = vpop.xlane.xlu1 %1031 }
 0x3a2   : > { %v1033_v28 = vadd.f32 %v1032_v27, %v1027_v26 }
 0x3a4   : > { %1035 = vst.msk [vmem:[%s1900_s10] sm:$0xff] %vm1034_vm9, %v1033_v28 }
 0x3a5   : > { %v1139_v37 = vpop.permute.xlu1 %1138 }
 0x3e8   : > { %v1535_v9 = vpop.f32.mrb[18].mxu1 }
 0x3e9   : > { %v1129_v30 = vadd.f32 %v1535_v9, %v1048_v29  ;;  %v1123_v31 = vpop.f32.mrb[19].mxu1 }
 0x3ea   : > { %v1124_v32 = vadd.f32 %v1123_v31, %v1043_v8 }
 0x3eb   : > { %v1133_v33 = vmax.f32 %v1129_v30, 0.0 }
 0x3ec   : > { %v1132_v34 = vmax.f32 %v1124_v32, 0.0 }
 0x3ee   : > { %v1608_v35 = vpack.c.bf16 %v1133_v33, %v1132_v34 }
 0x3f0   : > { %1609 = vmatpush3.bf16.msra.mxu1 %v1608_v35 }
 0x3f3   : > { %1541 = vmatmul.mubr.msk.f32.vlgmr.msra.gmra.mrb[20].mxu1 %vm1141_vm10, %v1134_v36 }
 0x4c6   : > { %v1211_v38 = vpop.f32.mrb[20].mxu1 }
 0x4c7   : > { %v1212_v39 = vadd.f32 %v1211_v38, %v1139_v37  ;;  %v1542_v40 = vpop.f32.mrb[21].mxu1 }
 0x4c9   : > { %1215 = vst [vmem:[%s1737_s26] sm:$0x3] %v1212_v39 }
 0x4ca PF: > { %s23_s19 = sadd.s32 1, %s1650_s19  }
 0x4cb   : > { %p20_p6 = scmp.ge.s32.totalorder %s23_s19, 5  }
 0x4cd   :  { %22 = sbr.rel (!%p20_p6) target bundleno = 2 (0x2), region = 98 }

</bundles_post_ra>
